<compile_context>
chip_gen: v7x
topology: tpu7x:2x2x1
jax: 0.10.0
libtpu: 0.0.40
codegen_flags: <defaults>
</compile_context>

<pallas_src>
import functools
import math

import jax
import jax.numpy as jnp
from jax import lax
from jax.experimental import pallas as pl
from jax.experimental.pallas import tpu as pltpu


# ---------------------------------------------------------------------------
# PE buffer construction (module __init__ work, plain JAX)
# ---------------------------------------------------------------------------
def build_pe(dim_embed: int, max_len: int) -> jnp.ndarray:
    position = jnp.arange(max_len, dtype=jnp.float32)[:, None]          # (L, 1)
    dim_pair = jnp.arange(0, dim_embed, 2, dtype=jnp.float32)           # (D/2,)
    div_term = jnp.exp(dim_pair * (-math.log(10000.0) / dim_embed))     # (D/2,)
    angles = position * div_term                                        # (L, D/2)
    pe = jnp.zeros((max_len, dim_embed), dtype=jnp.float32)
    pe = pe.at[:, 0::2].set(jnp.sin(angles))
    pe = pe.at[:, 1::2].set(jnp.cos(angles))
    return pe                                                            # (L, D)


_GOLDEN = 0x9E3779B9
_FMIX_M1 = 0x85EBCA6B
_FMIX_M2 = 0xC2B2AE35


# ---------------------------------------------------------------------------
# Kernel: y = dropout(x + pe) on one (TB, TR, C) tile
# ---------------------------------------------------------------------------
def _pos_enc_kernel(seed_ref, x_ref, pe_ref, o_ref, *,
                    p_dropout, training, use_hw_prng,
                    rows_per_plane, tile_rows, tile_batch, n_batch_tiles):
    x = x_ref[...]                       # (TB, TR, C)
    pe = pe_ref[...]                     # (TR, C), same dtype as x
    y = x + pe                           # broadcasts over TB; native dtype

    if training and p_dropout > 0.0:
        tb, tr, c = y.shape
        s_idx = pl.program_id(0)         # seq-tile index (outer grid axis)
        b_idx = pl.program_id(1)         # batch-tile index (inner grid axis)
        threshold = jnp.uint32(min(int(round(p_dropout * (2.0 ** 32))),
                                   2 ** 32 - 1))

        if use_hw_prng:
            # Hardware PRNG: one distinct stream per (seed, tile).  Offloads
            # bit generation so training mode stays HBM-bound (v6e/v7x).
            tile_id = s_idx * jnp.int32(n_batch_tiles) + b_idx
            pltpu.prng_seed(seed_ref[0] * jnp.int32(65537) + tile_id)
            bits = pltpu.bitcast(pltpu.prng_random_bits((tb, tr, c)),
                                 jnp.uint32)
        else:
            # Fallback (non-TPU / interpret): stateless murmur3-fmix32 of the
            # global element id; reproducible and independent of tiling.
            # NOTE: int32 element ids wrap for >=2^31-element tensors.
            b0 = b_idx * tile_batch
            r0 = s_idx * tile_rows
            base = ((b0 * rows_per_plane + r0) * c).astype(jnp.uint32)
            bi = lax.broadcasted_iota(jnp.int32, (tb, tr, c), 0)
            ri = lax.broadcasted_iota(jnp.int32, (tb, tr, c), 1)
            ci = lax.broadcasted_iota(jnp.int32, (tb, tr, c), 2)
            elem = (bi * (rows_per_plane * c) + ri * c + ci).astype(jnp.uint32)
            h = (elem + base) ^ (seed_ref[0].astype(jnp.uint32)
                                 * jnp.uint32(_GOLDEN))
            h = h ^ (h >> 16)
            h = h * jnp.uint32(_FMIX_M1)
            h = h ^ (h >> 13)
            h = h * jnp.uint32(_FMIX_M2)
            h = h ^ (h >> 16)
            bits = h

        keep = bits >= threshold                           # P(drop) = p_dropout
        scale = jnp.asarray(1.0 / (1.0 - p_dropout), dtype=y.dtype)
        y = jnp.where(keep, y * scale, jnp.zeros_like(y))  # inverted dropout

    o_ref[...] = y.astype(o_ref.dtype)


# ---------------------------------------------------------------------------
# Tiling helpers
# ---------------------------------------------------------------------------
def _sublane_rows(itemsize):
    return {4: 8, 2: 16, 1: 32}.get(itemsize, 8)


def _target_tile_bytes():
    # ~4 MiB/buffer when VMEM is plentiful (v5e/v6e: 128 MiB physical),
    # ~2 MiB on parts with less VMEM (v7x: 64 MiB per TensorCore).
    try:
        info = pltpu.get_tpu_info()
        vmem = int(getattr(info, "vmem_capacity_bytes", 128 << 20))
    except Exception:
        vmem = 128 << 20
    return (4 << 20) if vmem >= (96 << 20) else (2 << 20)


def _choose_plane_view(S, D):
    """Lane-dense per-batch plane view: returns (R, C, flatten, D_padded)."""
    if D % 128 == 0:
        return S, D, False, D
    total = S * D
    if total % 128 == 0:
        C = 128
        for cand in (2048, 1024, 512, 256):     # widest lane-dense row that divides
            if total % cand == 0:
                C = cand
                break
        return total // C, C, True, D
    # TODO(synk): padding D->128-multiple costs extra HBM traffic when D is
    # small; it trades that for unmasked lane-dense stores.
    Dp = ((D + 127) // 128) * 128
    return S, Dp, False, Dp


def _choose_tiles(B, R, C, itemsize, sublane, target_bytes):
    """Pick (TB, TR): batch elems per tile and rows per tile (TB|B, TR|R)."""
    plane = R * C * itemsize
    if plane <= target_bytes:
        tr = R
        tb = max(1, min(B, target_bytes // max(plane, 1)))
        while B % tb:
            tb -= 1
    else:
        tb = 1
        if R <= sublane:
            tr = R
        else:
            tr = max(sublane,
                     (target_bytes // (C * itemsize)) // sublane * sublane)
            tr = min(tr, R)
            while R % tr and tr > sublane:
                tr -= sublane
            if R % tr:
                tr = R           # full-dim fallback: always layout-legal
    return tb, tr


# ---------------------------------------------------------------------------
# Wrapper
# ---------------------------------------------------------------------------
def positional_encoding(x, pe, *, p_dropout=0.1, training=False, seed=0,
                        use_hw_prng=None, tile_target_bytes=None):
    """x: (B, S, D); pe: (max_len, D).  Returns dropout(x + pe[:S])."""
    B, S, D = x.shape
    max_len, d_pe = pe.shape
    assert d_pe == D and max_len >= S
    if training:
        assert 0.0 <= p_dropout < 1.0
    if use_hw_prng is None:
        use_hw_prng = (jax.default_backend() == "tpu")

    isz = x.dtype.itemsize
    sublane = _sublane_rows(isz)
    target = (int(tile_target_bytes) if tile_target_bytes is not None
              else _target_tile_bytes())

    R, C, flatten, Dp = _choose_plane_view(S, D)

    pe_s = pe[:S].astype(x.dtype)             # tiny one-time slice + cast
    if flatten:
        x_view = x.reshape(B, R, C)            # free row-major view
        pe_view = pe_s.reshape(R, C)
    elif Dp != D:
        x_view = jnp.pad(x, ((0, 0), (0, 0), (0, Dp - D)))
        pe_view = jnp.pad(pe_s, ((0, 0), (0, Dp - D)))
    else:
        x_view = x
        pe_view = pe_s

    TB, TR = _choose_tiles(B, R, C, isz, sublane, target)
    n_seq_tiles = R // TR
    n_batch_tiles = B // TB

    kernel = functools.partial(
        _pos_enc_kernel,
        p_dropout=float(p_dropout),
        training=bool(training),
        use_hw_prng=bool(use_hw_prng),
        rows_per_plane=int(R),
        tile_rows=int(TR),
        tile_batch=int(TB),
        n_batch_tiles=int(n_batch_tiles),
    )

    grid_spec = pltpu.PrefetchScalarGridSpec(
        num_scalar_prefetch=1,                          # seed -> SMEM
        grid=(n_seq_tiles, n_batch_tiles),              # seq OUTER, batch INNER
        in_specs=[
            pl.BlockSpec((TB, TR, C), lambda s, b, seed: (b, s, 0)),    # x
            pl.BlockSpec((TR, C), lambda s, b, seed: (s, 0)),           # pe
        ],
        out_specs=pl.BlockSpec((TB, TR, C), lambda s, b, seed: (b, s, 0)),
    )

    # Explicit VMEM budget: double-buffered x/out/pe tiles + slack, so the
    # bigger tiles fit regardless of a generation's default scoped-VMEM limit.
    tile_bytes = TB * TR * C * isz
    pe_tile_bytes = TR * C * isz
    vmem_limit = int(min(max(2 * (2 * tile_bytes + pe_tile_bytes) + (2 << 20),
                             16 << 20),
                         48 << 20))

    out = pl.pallas_call(
        kernel,
        out_shape=jax.ShapeDtypeStruct((B, R, C), x.dtype),
        grid_spec=grid_spec,
        compiler_params=pltpu.CompilerParams(
            # stateless per-tile randomness => no cross-step state => both
            # grid axes parallel (lets v7x shard across its 2 TensorCores).
            dimension_semantics=("parallel", "parallel"),
            vmem_limit_bytes=vmem_limit,
        ),
        cost_estimate=pl.CostEstimate(
            flops=B * R * C,
            transcendentals=0,
            bytes_accessed=(2 * B * R * C + R * C) * isz,
        ),
    )(jnp.array([seed], dtype=jnp.int32), x_view, pe_view)

    if flatten:
        return out.reshape(B, S, D)
    if Dp != D:
        return out[:, :, :D]
    return out


# ---------------------------------------------------------------------------
# Demo / self-check
# ---------------------------------------------------------------------------
if __name__ == "__main__":
    P_DROPOUT = 0.1
    key = jax.random.PRNGKey(0)
    k1, k2, k3, k4 = jax.random.split(key, 4)

    # --- Case A: module defaults (D=32) -> flattened lane-dense view ---------
    B, S, D, MAX_LEN = 2, 8, 32, 64
    x = jax.random.normal(k1, (B, S, D), dtype=jnp.float32)
    pe = build_pe(D, MAX_LEN)
    ref = x + pe[:S][None, :, :]

    y_eval = jax.block_until_ready(
        positional_encoding(x, pe, p_dropout=P_DROPOUT, training=False))
    assert y_eval.shape == (B, S, D)
    assert jnp.allclose(y_eval, ref, atol=1e-6), "eval-mode mismatch (case A)"

    y_train = jax.block_until_ready(
        positional_encoding(x, pe, p_dropout=P_DROPOUT, training=True, seed=1234))
    kept = y_train != 0.0
    scale = jnp.float32(1.0 / (1.0 - P_DROPOUT))
    assert jnp.allclose(jnp.where(kept, y_train, 0.0),
                        jnp.where(kept, ref * scale, 0.0),
                        atol=1e-5), "train-mode dropout scaling mismatch (A)"
    drop_frac = 1.0 - float(jnp.mean(kept.astype(jnp.float32)))
    assert 0.0 < drop_frac < 0.35, f"dropout rate looks wrong: {drop_frac}"

    # --- Case B: lane-aligned D=128, batched (TB=2) tile ---------------------
    B2, S2, D2 = 2, 16, 128
    x2 = jax.random.normal(k2, (B2, S2, D2), dtype=jnp.float32)
    pe2 = build_pe(D2, 64)
    ref2 = x2 + pe2[:S2][None, :, :]
    y2 = jax.block_until_ready(
        positional_encoding(x2, pe2, p_dropout=P_DROPOUT, training=False))
    assert jnp.allclose(y2, ref2, atol=1e-6), "eval-mode mismatch (case B)"

    # --- Case C: bf16 input -> native-dtype compute path ---------------------
    B3, S3, D3 = 2, 32, 128
    x3 = jax.random.normal(k3, (B3, S3, D3), dtype=jnp.bfloat16)
    pe3 = build_pe(D3, 64)
    ref3 = x3.astype(jnp.float32) + pe3[:S3][None, :, :]
    y3 = jax.block_until_ready(
        positional_encoding(x3, pe3, p_dropout=P_DROPOUT, training=False))
    assert y3.dtype == jnp.bfloat16
    assert jnp.allclose(y3.astype(jnp.float32), ref3, atol=0.0625), \
        "eval-mode mismatch (case C, bf16)"

    # --- Case D: force a multi-tile grid (seq + batch axes) ------------------
    B4, S4, D4 = 2, 128, 128
    x4 = jax.random.normal(k4, (B4, S4, D4), dtype=jnp.float32)
    pe4 = build_pe(D4, 128)
    ref4 = x4 + pe4[:S4][None, :, :]
    y4 = jax.block_until_ready(
        positional_encoding(x4, pe4, p_dropout=P_DROPOUT, training=False,
                            tile_target_bytes=16 << 10))   # grid = (4, 2)
    assert jnp.allclose(y4, ref4, atol=1e-6), "eval-mode mismatch (case D)"

    y4a = jax.block_until_ready(
        positional_encoding(x4, pe4, p_dropout=P_DROPOUT, training=True,
                            seed=7, tile_target_bytes=16 << 10))
    y4b = jax.block_until_ready(
        positional_encoding(x4, pe4, p_dropout=P_DROPOUT, training=True,
                            seed=7, tile_target_bytes=16 << 10))
    assert jnp.array_equal(y4a, y4b), "train-mode not deterministic for fixed seed"
    kept4 = y4a != 0.0
    assert jnp.allclose(jnp.where(kept4, y4a, 0.0),
                        jnp.where(kept4, ref4 * scale, 0.0),
                        atol=1e-5), "train-mode dropout scaling mismatch (D)"
    drop4 = 1.0 - float(jnp.mean(kept4.astype(jnp.float32)))
    assert 0.05 < drop4 < 0.2, f"dropout rate looks wrong (D): {drop4}"

    print("KERNEL_OK")
</pallas_src>

<mosaic_0001>
module attributes {stable_mosaic.version = 11 : i64} {
  func.func @_pos_enc_kernel(%arg0: i32, %arg1: i32, %arg2: memref<1xi32, #tpu.memory_space<smem>>, %arg3: memref<2x1x256xf32, #tpu.memory_space<vmem>>, %arg4: memref<1x256xf32, #tpu.memory_space<vmem>>, %arg5: memref<2x1x256xf32, #tpu.memory_space<vmem>>) attributes {dimension_semantics = [#tpu.dimension_semantics<parallel>, #tpu.dimension_semantics<parallel>], iteration_bounds = array<i64: 1, 1>, scalar_prefetch = 1 : i64, scratch_operands = 0 : i64, tpu.core_type = #tpu.core_type<tc>, window_params = [{transform_indices = @transform_0, window_bounds = array<i64: 2, 1, 256>}, {transform_indices = @transform_1, window_bounds = array<i64: 1, 256>}, {transform_indices = @transform_2, window_bounds = array<i64: 2, 1, 256>}]} {
    %c0 = arith.constant 0 : index
    %c0_0 = arith.constant 0 : index
    %c0_1 = arith.constant 0 : index
    %0 = vector.load %arg3[%c0, %c0_0, %c0_1] : memref<2x1x256xf32, #tpu.memory_space<vmem>>, vector<2x1x256xf32>
    %c0_2 = arith.constant 0 : index
    %c0_3 = arith.constant 0 : index
    %1 = vector.load %arg4[%c0_2, %c0_3] : memref<1x256xf32, #tpu.memory_space<vmem>>, vector<1x256xf32>
    %2 = vector.shape_cast %1 : vector<1x256xf32> to vector<1x1x256xf32>
    %3 = vector.broadcast %2 : vector<1x1x256xf32> to vector<2x1x256xf32>
    %4 = arith.addf %0, %3 : vector<2x1x256xf32>
    %c0_4 = arith.constant 0 : index
    %c0_5 = arith.constant 0 : index
    %c0_6 = arith.constant 0 : index
    %5 = vector.load %arg5[%c0_4, %c0_5, %c0_6] : memref<2x1x256xf32, #tpu.memory_space<vmem>>, vector<2x1x256xf32>
    tpu.vector_store %arg5[%c0_4, %c0_5, %c0_6], %4 {strides = array<i32>} : memref<2x1x256xf32, #tpu.memory_space<vmem>>, vector<2x1x256xf32>,
    return
  }
  func.func @transform_0(%arg0: i32, %arg1: i32, %arg2: memref<1xi32, #tpu.memory_space<smem>>) -> (i32, i32, i32) {
    %c0_i32 = arith.constant 0 : i32
    %c0_i32_0 = arith.constant 0 : i32
    return %arg1, %arg0, %c0_i32 : i32, i32, i32
  }
  func.func @transform_1(%arg0: i32, %arg1: i32, %arg2: memref<1xi32, #tpu.memory_space<smem>>) -> (i32, i32) {
    %c0_i32 = arith.constant 0 : i32
    %c0_i32_0 = arith.constant 0 : i32
    return %arg0, %c0_i32 : i32, i32
  }
  func.func @transform_2(%arg0: i32, %arg1: i32, %arg2: memref<1xi32, #tpu.memory_space<smem>>) -> (i32, i32, i32) {
    %c0_i32 = arith.constant 0 : i32
    %c0_i32_0 = arith.constant 0 : i32
    return %arg1, %arg0, %c0_i32 : i32, i32, i32
  }
}

</mosaic_0001>

<bundles_post_ra>
// kernel: tpu_custom_call.1
= control target key start
LH: loop header
LB: loop body
LE: loop exit
PB: predicated region body
PF: predicated region fallthrough
CT: control target
= control target key end

     0   :  { %9 = vsyncpa [#allocation5], 0  ;;  %s165_s0 = inlined_call_operand.<no memory space> [shape: s32[1], index: 0, kind: input, shape index: {}]   ;;  %s166_s1 = inlined_call_operand.hbm [shape: f32[2,1,256], index: 1, kind: input, shape index: {}]   ;;  %s167_s2 = inlined_call_operand.vmem [shape: f32[1,256], index: 2, kind: input, shape index: {}]   ;;  %s168_s3 = inlined_call_operand.hbm [shape: f32[2,1,256], index: 3, kind: output, shape index: {}]  }
   0x1   :  { %10 = vsyncpa [#allocation6], 0  ;;  %s108_s12 = smov [#allocation4]   ;;  %s60_s16 = scalar_lea.hbm %s166_s1, 64 }
   0x2   :  { %s16_s13 = sshll.u32 %s108_s12, 4  ;;  %p61_p0 = scmp.ne.s32.totalorder %s166_s1, %s60_s16  ;;  %s17_s13 = int_to_ptr.vmem [resolvable:$true] %s16_s13 }
   0x3   :  { %p64_p1 = scmp.lt.u32.totalorder %s60_s16, %s166_s1 }
   0x5   :  { %p66_p2 = pnand %p64_p1, %p61_p0 }
   0x7   :  { %69 = shalt.err (!%p66_p2)
}
   0x8   :  { %s70_s20 = scalar_lea.vmem %s17_s13, 64  ;;  %p75_p4 = scmp.lt.s32.totalorder %s17_s13, %s17_s13 }
   0x9   :  { %p71_p3 = scmp.ne.s32.totalorder %s17_s13, %s70_s20  ;;  %p76_p5 = scmp.lt.s32.totalorder %s70_s20, %s70_s20 }
   0xb   :  { %p77_p6 = por %p76_p5, %p75_p4 }
   0xd   :  { %p78_p7 = pnand %p77_p6, %p71_p3 }
   0xf   :  { %81 = shalt.err (!%p78_p7)
}
  0x10   :  { %s109_s21 = smov 32   ;;  %s110_s22 = smov 2  }
  0x11   :  { %22 = dma.hbm_to_vmem [thread:$0]  %s166_s1, 64, %s17_s13, [#allocation5], %s109_s21, %s109_s21, %s110_s22  }
  0x12   :  { %104 = dma.done.wait [#allocation5], 64  }
  0x13   :  { %105 = vsyncadd [#allocation5], 4294967232  ;;  %v33_v0 = vlaneseq  ;;  %s111_s25 = smov [#allocation7]   ;;  %v28_v1 = vld [vmem:[#allocation4] sm:$0x3] }
  0x14   :  { %s44_s26 = sshll.u32 %s111_s25, 4  ;;  %v30_v2 = vld [vmem:[%s167_s2] sm:$0x3]  ;;  %v29_v3 = vld [vmem:[#allocation4 + $0x2] sm:$0x3]  ;;  %s45_s26 = int_to_ptr.vmem [resolvable:$true] %s44_s26 }
  0x15   :  { %vm35_vm0 = vcmp.lt.s32.totalorder %v33_v0, 256  ;;  %v31_v4 = vadd.f32 %v30_v2, %v28_v1  ;;  %v32_v5 = vadd.f32 %v30_v2, %v29_v3  ;;  %s82_s29 = scalar_lea.vmem %s45_s26, 64  ;;  %p87_p9 = scmp.lt.s32.totalorder %s45_s26, %s45_s26 }
  0x16   :  { %p83_p8 = scmp.ne.s32.totalorder %s45_s26, %s82_s29  ;;  %p88_p10 = scmp.lt.s32.totalorder %s82_s29, %s82_s29 }
  0x17   :  { %37 = vst.msk [vmem:[#allocation7] sm:$0x3] %vm35_vm0, %v31_v4  ;;  %38 = vst.msk [vmem:[#allocation7 + $0x2] sm:$0x3] %vm35_vm0, %v32_v5 }
  0x18   :  { %p89_p11 = por %p88_p10, %p87_p9 }
  0x1a   :  { %p90_p12 = pnand %p89_p11, %p83_p8 }
  0x1c   :  { %93 = shalt.err (!%p90_p12)
}
  0x1d   :  { %s94_s4 = scalar_lea.hbm %s168_s3, 64 }
  0x1e   :  { %p95_p13 = scmp.ne.s32.totalorder %s168_s3, %s94_s4  ;;  %p98_p0 = scmp.lt.u32.totalorder %s94_s4, %s168_s3 }
  0x20   :  { %p100_p1 = pnand %p98_p0, %p95_p13 }
  0x22   :  { %103 = shalt.err (!%p100_p1)
}
  0x23   :  { %50 = dma.vmem_to_hbm [thread:$0]  %s45_s26, 64, %s168_s3, [#allocation6], %s109_s21, %s109_s21, %s110_s22  }
  0x24   :  { %106 = dma.done.wait [#allocation6], 64  }
  0x25   :  { %107 = vsyncadd [#allocation6], 4294967232 }
  0x26   :  { %54 = vsyncpa [#allocation5], 1 }
  0x27   :  { %55 = vsyncpa [#allocation6], 1 }

</bundles_post_ra>
